<compile_context>
chip_gen: v7x
topology: tpu7x:2x2x1
jax: 0.10.0
libtpu: 0.0.40
codegen_flags: <defaults>
</compile_context>

<pallas_src>
import jax
import jax.numpy as jnp
from jax.experimental import pallas as pl
from jax.experimental.pallas import tpu as pltpu  # noqa: F401  (TPU backend)

# Problem sizes (small, consistent with the module's conv autoencoder shapes).
N, CIN, H, W = 2, 4, 16, 16
CENC = 8                 # "fewer filters" bottleneck channel count
COUT = CIN
KH = KW = 3              # encoder conv kernel
HE, WE = H // 2, W // 2  # encoder output spatial dims (stride 2, pad 1) -> 8x8
KD = 2                   # decoder ConvTranspose kernel == stride
KKC = KH * KW * CIN      # 36 patch features per output pixel


def _autoencoder_kernel(p_ref, we_ref, be_ref, wd_ref, bd_ref, o_ref):
    # p_ref  : (KKC, N*HE*WE)        = (36, 128)  transposed im2col patches (lane-dense)
    # we_ref : (CENC, KKC)           = (8, 36)    encoder conv weights
    # be_ref : (CENC, 1)                          encoder bias (broadcast over lanes)
    # wd_ref : (KD*KD*COUT, CENC)    = (16, 8)    decoder ConvTranspose weights
    # bd_ref : (KD*KD*COUT, 1)                    decoder bias (broadcast over lanes)
    # o_ref  : (KD*KD*COUT, N*HE*WE) = (16, 128)  lane-dense output slab
    # ---- encoder: conv-as-matmul + bias + ReLU (MXU + VPU) ----
    enc = jnp.dot(we_ref[...], p_ref[...], preferred_element_type=jnp.float32)
    enc = jnp.maximum(enc + be_ref[...], 0.0)
    # ---- decoder: ConvTranspose2d(k=2, s=2) == matmul CENC -> (cout, a, b) rows ----
    dec = jnp.dot(wd_ref[...], enc, preferred_element_type=jnp.float32) + bd_ref[...]
    # ---- sigmoid: exp on EUP; approx reciprocal on EUP + one Newton step (no VPU divide) ----
    denom = 1.0 + jnp.exp(-dec)
    r = pl.reciprocal(denom, approx=True)
    r = r * (2.0 - denom * r)          # Newton refinement: restores ~f32 accuracy
    o_ref[...] = r


def autoencoder_forward(x, w_e, b_e, w_d, b_d):
    """x: (N, CIN, H, W) float32, PyTorch NCHW. Returns (N, COUT, H, W)."""
    n = x.shape[0]
    pix = n * HE * WE

    # --- glue: im2col for the stride-2, pad-1, 3x3 encoder conv, built directly in
    #     the transposed, lane-dense layout (rows = (kh, kw, c), cols = (n, i, j)).
    x_pad = jnp.pad(x, ((0, 0), (0, 0), (1, 1), (1, 1)))         # (N, CIN, 18, 18)
    taps = [x_pad[:, :, kh:kh + 2 * HE:2, kw:kw + 2 * WE:2]      # each (N, CIN, 8, 8)
            for kh in range(KH) for kw in range(KW)]
    patches_t = jnp.stack(taps, axis=0)                          # (9, N, CIN, 8, 8)
    patches_t = jnp.transpose(patches_t, (0, 2, 1, 3, 4)).reshape(KKC, pix)

    # --- glue: weight/bias reshapes (PyTorch layouts -> transposed matmul layouts) ---
    # Conv2d weight (CENC, CIN, KH, KW) -> (CENC, (kh, kw, c)) matching patch rows.
    we_t = jnp.transpose(w_e, (0, 2, 3, 1)).reshape(CENC, KKC)
    be_col = b_e.reshape(CENC, 1)
    # ConvTranspose2d weight (CENC, COUT, KD, KD) -> ((cout, a, b), CENC).
    wd_t = jnp.transpose(w_d, (1, 2, 3, 0)).reshape(KD * KD * COUT, CENC)
    bd_col = jnp.repeat(b_d, KD * KD).reshape(KD * KD * COUT, 1)

    # Single kernel invocation: no grid, every operand is one whole-array VMEM block.
    out_t = pl.pallas_call(
        _autoencoder_kernel,
        out_shape=jax.ShapeDtypeStruct((KD * KD * COUT, pix), jnp.float32),
    )(patches_t, we_t, be_col, wd_t, bd_col)

    # --- glue: (cout, a, b) x (n, i, j) slab -> NCHW via a single transpose ---
    out = out_t.reshape(COUT, KD, KD, n, HE, WE)
    out = jnp.transpose(out, (3, 0, 4, 1, 5, 2)).reshape(n, COUT, H, W)
    return out


def reference_forward(x, w_e, b_e, w_d, b_d):
    """Pure-JAX reference (matches PyTorch Conv2d / ConvTranspose2d semantics)."""
    enc = jax.lax.conv_general_dilated(
        x, w_e, window_strides=(2, 2), padding=((1, 1), (1, 1)),
        dimension_numbers=("NCHW", "OIHW", "NCHW"))
    enc = jnp.maximum(enc + b_e[None, :, None, None], 0.0)
    dec = jnp.einsum("ncij,cdab->ndiajb", enc, w_d).reshape(x.shape[0], COUT, H, W)
    dec = dec + b_d[None, :, None, None]
    return jax.nn.sigmoid(dec)


if __name__ == "__main__":
    key = jax.random.PRNGKey(0)
    kx, k1, k2, k3, k4 = jax.random.split(key, 5)
    x = jax.random.normal(kx, (N, CIN, H, W), dtype=jnp.float32)
    # Deterministic synthetic parameters (PyTorch layouts).
    w_e = 0.1 * jax.random.normal(k1, (CENC, CIN, KH, KW), dtype=jnp.float32)
    b_e = 0.1 * jax.random.normal(k2, (CENC,), dtype=jnp.float32)
    w_d = 0.1 * jax.random.normal(k3, (CENC, COUT, KD, KD), dtype=jnp.float32)
    b_d = 0.1 * jax.random.normal(k4, (COUT,), dtype=jnp.float32)

    fwd = jax.jit(autoencoder_forward)
    y = fwd(x, w_e, b_e, w_d, b_d)
    jax.block_until_ready(y)

    y_ref = reference_forward(x, w_e, b_e, w_d, b_d)
    assert y.shape == (N, COUT, H, W), y.shape
    err = float(jnp.max(jnp.abs(y - y_ref)))
    assert err < 1e-3, err
    print("KERNEL_OK")
</pallas_src>

<mosaic_0001>
module attributes {stable_mosaic.version = 11 : i64} {
  func.func @_autoencoder_kernel(%arg0: memref<36x128xf32, #tpu.memory_space<vmem>>, %arg1: memref<8x36xf32, #tpu.memory_space<vmem>>, %arg2: memref<8x1xf32, #tpu.memory_space<vmem>>, %arg3: memref<16x8xf32, #tpu.memory_space<vmem>>, %arg4: memref<16x1xf32, #tpu.memory_space<vmem>>, %arg5: memref<16x128xf32, #tpu.memory_space<vmem>>) attributes {dimension_semantics = [], scalar_prefetch = 0 : i64, scratch_operands = 0 : i64, tpu.core_type = #tpu.core_type<tc>} {
    %c0 = arith.constant 0 : index
    %c0_0 = arith.constant 0 : index
    %0 = vector.load %arg1[%c0, %c0_0] : memref<8x36xf32, #tpu.memory_space<vmem>>, vector<8x36xf32>
    %c0_1 = arith.constant 0 : index
    %c0_2 = arith.constant 0 : index
    %1 = vector.load %arg0[%c0_1, %c0_2] : memref<36x128xf32, #tpu.memory_space<vmem>>, vector<36x128xf32>
    %cst = arith.constant dense<0.000000e+00> : vector<8x128xf32>
    %2 = tpu.matmul %0, %1, %cst {dimension_numbers = #tpu.dot_dimension_numbers<[1], [0], [0], [1], [0, 0, 1, 1], [], []>} : vector<8x36xf32>, vector<36x128xf32>, vector<8x128xf32> -> vector<8x128xf32>
    %c0_3 = arith.constant 0 : index
    %c0_4 = arith.constant 0 : index
    %3 = vector.load %arg2[%c0_3, %c0_4] : memref<8x1xf32, #tpu.memory_space<vmem>>, vector<8x1xf32>
    %4 = vector.broadcast %3 : vector<8x1xf32> to vector<8x128xf32>
    %5 = arith.addf %2, %4 : vector<8x128xf32>
    %cst_5 = arith.constant 0.000000e+00 : f32
    %6 = vector.broadcast %cst_5 : f32 to vector<8x128xf32>
    %7 = arith.maximumf %5, %6 : vector<8x128xf32>
    %c0_6 = arith.constant 0 : index
    %c0_7 = arith.constant 0 : index
    %8 = vector.load %arg3[%c0_6, %c0_7] : memref<16x8xf32, #tpu.memory_space<vmem>>, vector<16x8xf32>
    %cst_8 = arith.constant dense<0.000000e+00> : vector<16x128xf32>
    %9 = tpu.matmul %8, %7, %cst_8 {dimension_numbers = #tpu.dot_dimension_numbers<[1], [0], [0], [1], [0, 0, 1, 1], [], []>} : vector<16x8xf32>, vector<8x128xf32>, vector<16x128xf32> -> vector<16x128xf32>
    %c0_9 = arith.constant 0 : index
    %c0_10 = arith.constant 0 : index
    %10 = vector.load %arg4[%c0_9, %c0_10] : memref<16x1xf32, #tpu.memory_space<vmem>>, vector<16x1xf32>
    %11 = vector.broadcast %10 : vector<16x1xf32> to vector<16x128xf32>
    %12 = arith.addf %9, %11 : vector<16x128xf32>
    %cst_11 = arith.constant 0.000000e+00 : f32
    %13 = vector.broadcast %cst_11 : f32 to vector<16x128xf32>
    %14 = arith.subf %13, %12 : vector<16x128xf32>
    %15 = math.exp %14 : vector<16x128xf32>
    %cst_12 = arith.constant 1.000000e+00 : f32
    %16 = vector.broadcast %cst_12 : f32 to vector<16x128xf32>
    %17 = arith.addf %16, %15 : vector<16x128xf32>
    %18 = tpu.reciprocal %17 {approx = true} : vector<16x128xf32> -> vector<16x128xf32>
    %19 = arith.mulf %17, %18 : vector<16x128xf32>
    %cst_13 = arith.constant 2.000000e+00 : f32
    %20 = vector.broadcast %cst_13 : f32 to vector<16x128xf32>
    %21 = arith.subf %20, %19 : vector<16x128xf32>
    %22 = arith.mulf %18, %21 : vector<16x128xf32>
    %c0_14 = arith.constant 0 : index
    %c0_15 = arith.constant 0 : index
    %23 = vector.load %arg5[%c0_14, %c0_15] : memref<16x128xf32, #tpu.memory_space<vmem>>, vector<16x128xf32>
    tpu.vector_store %arg5[%c0_14, %c0_15], %22 {strides = array<i32>} : memref<16x128xf32, #tpu.memory_space<vmem>>, vector<16x128xf32>,
    return
  }
}

</mosaic_0001>

<bundles_post_ra>
// kernel: autoencoder_forward.1
= control target key start
LH: loop header
LB: loop body
LE: loop exit
PB: predicated region body
PF: predicated region fallthrough
CT: control target
= control target key end

     0   :  { %v280_v0 = vmov 0.0|0.0   ;;  %vm281_vm0 = vmmov 0   ;;  %v282_v4 = vmov 0.0   ;;  %v283_v7 = vmov 0   ;;  %s353_s0 = inlined_call_operand.vmem [shape: f32[36,128], index: 0, kind: input, shape index: {}]   ;;  %s354_s2 = inlined_call_operand.vmem [shape: f32[8,1], index: 2, kind: input, shape index: {}]   ;;  %s355_s4 = inlined_call_operand.vmem [shape: f32[16,1], index: 4, kind: input, shape index: {}]   ;;  %s356_s1 = inlined_call_operand.vmem [shape: f32[8,36], index: 1, kind: input, shape index: {}]   ;;  %s357_s3 = inlined_call_operand.vmem [shape: f32[16,8], index: 3, kind: input, shape index: {}]   ;;  %s358_s5 = inlined_call_operand.vmem [shape: f32[16,128], index: 5, kind: output, shape index: {}]  }
   0x1   :  { %260 = vmatprep.subr.bf16.mxu0 %v280_v0  ;;  %v21_v1 = vld [vmem:[%s353_s0] sm:$0xff]  ;;  %v22_v2 = vld [vmem:[%s353_s0 + $0x8] sm:$0xff]  ;;  %v23_v3 = vld [vmem:[%s353_s0 + $0x10] sm:$0xff]  ;;  %252 = vmatprep.mubr.msk.f32.mxu0 %vm281_vm0, %v282_v4  ;;  %vm36_vm1 = vcmask 1043456   ;;  %vm32_vm2 = vcmask 293888   ;;  %vm125_vm3 = vcmask 64512  }
   0x2   :  { %v261_v5 = vpack.c.bf16 %v22_v2, %v21_v1  ;;  %v24_v6 = vld [vmem:[%s353_s0 + $0x18] sm:$0xff]  ;;  %270 = vset.pattern.permute.xlu0 %v283_v7  ;;  %271 = vset.pattern.permute.xlu1 %v283_v7  ;;  %v26_v8 = vld [vmem:[%s354_s2] sm:$0xff]  ;;  %v114_v14 = vld [vmem:[%s355_s4 + $0x8] sm:$0xff] }
   0x3   :  { %v264_v9 = vpack.c.bf16 %v24_v6, %v23_v3  ;;  %29 = vperm.xlu0 %270, %v26_v8   ;;  %v113_v10 = vld [vmem:[%s355_s4] sm:$0xff]  ;;  %122 = vperm.xlu1 %271, %v114_v14   ;;  %v112_v20 = vld [vmem:[%s357_s3 + $0x8] sm:$0xff] }
   0x4   :  { %262 = vmatpush3.bf16.msra.mxu0 %v261_v5  ;;  %v25_v11 = vld [vmem:[%s353_s0 + $0x20] sm:$0xf] }
   0x5   :  { %263 = vmatprep.subr.bf16.mxu0 %v280_v0  ;;  %v20_v12 = vld [vmem:[%s356_s1] sm:$0xff] }
   0x6   :  { %v111_v13 = vld [vmem:[%s357_s3] sm:$0xff] }
   0x7   :  { %117 = vperm.xlu0 %270, %v113_v10   ;;  %257 = vmatprep.mubr.msk.f32.mxu1 %vm125_vm3, %v111_v13 }
   0x8   :  { %265 = vmatpush3.bf16.msra.mxu0 %v264_v9 }
   0x9   :  { %250 = vmatprep.subr.mxu0 %v282_v4 }
   0xc   :  { %251 = vmatpush3.msk.msra.mxu0 %vm36_vm1, %v25_v11 }
   0xd   :  { %253 = vmatmul.mubr.msk.f32.vlgmr.msra.gmra.mrb[0].mxu0 %vm32_vm2, %v20_v12 }
  0x82   :  { %v30_v15 = vpop.permute.xlu0 %29  ;;  %v123_v21 = vpop.permute.xlu1 %122 }
  0x86   :  { %v118_v23 = vpop.permute.xlu0 %117 }
  0xe0   :  { %v106_v16 = vpop.f32.mrb[0].mxu0 }
  0xe1   :  { %v107_v17 = vadd.f32 %v106_v16, %v30_v15  ;;  %v254_v18 = vpop.f32.mrb[1].mxu0 }
  0xe3   :  { %v110_v19 = vmax.f32 %v107_v17, 0.0 }
  0xe5   :  { %255 = vmatprep.subr.mxu1 %v110_v19 }
  0xe6   :  { %256 = vmatpush3.msra.mxu1 %v110_v19 }
  0xe7   :  { %258 = vmatmul.mubr.msk.f32.vlgmr.msra.gmra.mrb[0].mxu1 %vm125_vm3, %v112_v20 }
 0x1ba   :  { %v259_v22 = vpop.f32.mrb[0].mxu1 }
 0x1bb   :  { %v204_v24 = vadd.f32 %v259_v22, %v123_v21  ;;  %v198_v25 = vpop.f32.mrb[1].mxu1 }
 0x1bc   :  { %v199_v26 = vadd.f32 %v198_v25, %v118_v23 }
 0x1bd   :  { %v208_v27 = vsub.f32 0.0, %v204_v24 }
 0x1be   :  { %v207_v28 = vsub.f32 0.0, %v199_v26 }
 0x1bf   :  { %v211_v29 = vmul.f32 1.442695, %v208_v27 }
 0x1c0   :  { %v209_v30 = vmul.f32 1.442695, %v207_v28 }
 0x1c1   :  { %272 = vpow2.f32 %v211_v29 }
 0x1c2   :  { %274 = vpow2.f32 %v209_v30 }
 0x1cb   :  { %v273_v31 = vpop.eup %272 }
 0x1cc   :  { %v275_v32 = vpop.eup %274  ;;  %v214_v33 = vadd.f32 1.0, %v273_v31 }
 0x1cd   :  { %v213_v34 = vadd.f32 1.0, %v275_v32 }
 0x1ce   :  { %276 = vrcp.f32 %v214_v33 }
 0x1cf   :  { %278 = vrcp.f32 %v213_v34 }
 0x1d8   :  { %v277_v35 = vpop.eup %276 }
 0x1d9   :  { %v279_v36 = vpop.eup %278  ;;  %v218_v37 = vmul.f32 %v277_v35, %v214_v33 }
 0x1da   :  { %v217_v38 = vmul.f32 %v279_v36, %v213_v34 }
 0x1db   :  { %v220_v39 = vsub.f32 2.0, %v218_v37 }
 0x1dc   :  { %v219_v40 = vsub.f32 2.0, %v217_v38 }
 0x1dd   :  { %v222_v41 = vmul.f32 %v277_v35, %v220_v39 }
 0x1de   :  { %v221_v42 = vmul.f32 %v279_v36, %v219_v40 }
 0x1df   :  { %224 = vst [vmem:[%s358_s5 + $0x8] sm:$0xff] %v222_v41 }
 0x1e0   :  { %223 = vst [vmem:[%s358_s5] sm:$0xff] %v221_v42 }

</bundles_post_ra>
